<compile_context>
chip_gen: v5e
topology: v5e:2x2
jax: 0.10.0
libtpu: 0.0.40
codegen_flags: <defaults>
</compile_context>

<pallas_src>
import math

import jax
import jax.numpy as jnp
from jax.experimental import pallas as pl
from jax.experimental.pallas import tpu as pltpu


# ----------------------------------------------------------------------------
# True Identity: no kernel launch at all (highest-value optimization).
# ----------------------------------------------------------------------------
def identity(x: jnp.ndarray) -> jnp.ndarray:
    """Identity.forward: return x unchanged (no Pallas call, zero cost)."""
    return x


# ----------------------------------------------------------------------------
# Optional Pallas copy path (only if a materialized call is required).
# ----------------------------------------------------------------------------
def _copy_kernel(x_ref, o_ref):
    # Straight VMEM copy of the current lane-dense (block_rows, lanes) slab.
    o_ref[...] = x_ref[...]


def _pick_2d_layout(total: int):
    """Flatten `total` elements to (rows, lanes) with lanes a multiple of 128."""
    candidates = [l for l in (4096, 2048, 1024, 512, 256, 128) if total % l == 0]
    if not candidates:
        return None
    # Prefer a layout whose row count tiles cleanly into 8-row sublane groups.
    for lanes in candidates:
        rows = total // lanes
        if rows >= 8 and rows % 8 == 0:
            return rows, lanes
    lanes = candidates[0]
    return total // lanes, lanes


def _pick_block_rows(rows: int, lanes: int, itemsize: int,
                     target_bytes: int = 2 << 20) -> int:
    """Largest row-slab (multiple of 8, divides rows) with <= ~2 MiB per block."""
    if rows % 8 != 0:
        # Fall back to the full extent (always a legal block shape).
        return rows
    target = max(8, target_bytes // (lanes * itemsize))
    target = (target // 8) * 8
    if target >= rows:
        return rows
    best = 8
    d = 8
    while d <= target:
        if rows % d == 0:
            best = d
        d += 8
    return best


def identity_pallas(x: jnp.ndarray) -> jnp.ndarray:
    """Identity as an explicit Pallas copy (lane-dense, row-slab tiled, aliased)."""
    total = math.prod(x.shape)
    layout = _pick_2d_layout(total)
    if layout is None:
        # Element count not a multiple of 128: no benefit to a kernel here.
        # TODO(synk): could pad/copy/slice, but Identity semantics make that pointless.
        return x

    rows, lanes = layout
    itemsize = jnp.dtype(x.dtype).itemsize
    block_rows = _pick_block_rows(rows, lanes, itemsize)
    grid = (rows // block_rows,)

    x2 = x.reshape(rows, lanes)
    spec = pl.BlockSpec((block_rows, lanes), lambda i: (i, 0))

    out = pl.pallas_call(
        _copy_kernel,
        out_shape=jax.ShapeDtypeStruct((rows, lanes), x.dtype),
        grid_spec=pltpu.PrefetchScalarGridSpec(
            num_scalar_prefetch=0,
            grid=grid,
            in_specs=[spec],
            out_specs=spec,
        ),
        compiler_params=pltpu.CompilerParams(
            dimension_semantics=("parallel",),
            # Blocks are <= 2 MiB each; double-buffered in+out stays << 32 MiB,
            # safe on v5e/v6e (128 MiB) and v7x (64 MiB physical).
            vmem_limit_bytes=32 << 20,
        ),
        # Let XLA reuse the input HBM buffer for the output when donated.
        input_output_aliases={0: 0},
    )(x2)
    return out.reshape(x.shape)


if __name__ == "__main__":
    key = jax.random.PRNGKey(0)
    x = jax.random.normal(key, (2, 4, 16, 16), dtype=jnp.float32)

    # Preferred path: no kernel at all.
    y0 = identity(x)
    jax.block_until_ready(y0)
    assert y0.shape == x.shape and y0.dtype == x.dtype
    assert bool(jnp.array_equal(y0, x))

    # Pallas copy path (for when a materialized call is required).
    y1 = identity_pallas(x)
    jax.block_until_ready(y1)
    assert y1.shape == x.shape and y1.dtype == x.dtype
    assert bool(jnp.array_equal(y1, x))

    print("KERNEL_OK")
</pallas_src>

<mosaic_0001>
module attributes {stable_mosaic.version = 11 : i64} {
  func.func @_copy_kernel(%arg0: i32, %arg1: memref<8x256xf32, #tpu.memory_space<vmem>>, %arg2: memref<8x256xf32, #tpu.memory_space<vmem>>) attributes {dimension_semantics = [#tpu.dimension_semantics<parallel>], iteration_bounds = array<i64: 1>, scalar_prefetch = 0 : i64, scratch_operands = 0 : i64, tpu.core_type = #tpu.core_type<tc>, window_params = [{transform_indices = @transform_0, window_bounds = array<i64: 8, 256>}, {transform_indices = @transform_1, window_bounds = array<i64: 8, 256>}]} {
    %c0 = arith.constant 0 : index
    %c0_0 = arith.constant 0 : index
    %0 = vector.load %arg1[%c0, %c0_0] : memref<8x256xf32, #tpu.memory_space<vmem>>, vector<8x256xf32>
    %c0_1 = arith.constant 0 : index
    %c0_2 = arith.constant 0 : index
    %1 = vector.load %arg2[%c0_1, %c0_2] : memref<8x256xf32, #tpu.memory_space<vmem>>, vector<8x256xf32>
    tpu.vector_store %arg2[%c0_1, %c0_2], %0 {strides = array<i32>} : memref<8x256xf32, #tpu.memory_space<vmem>>, vector<8x256xf32>,
    return
  }
  func.func @transform_0(%arg0: i32) -> (i32, i32) {
    %c0_i32 = arith.constant 0 : i32
    %c0_i32_0 = arith.constant 0 : i32
    return %arg0, %c0_i32 : i32, i32
  }
  func.func @transform_1(%arg0: i32) -> (i32, i32) {
    %c0_i32 = arith.constant 0 : i32
    %c0_i32_0 = arith.constant 0 : i32
    return %arg0, %c0_i32 : i32, i32
  }
}

</mosaic_0001>

<bundles_post_ra>
// kernel: tpu_custom_call.1
= control target key start
LH: loop header
LB: loop body
LE: loop exit
PB: predicated region body
PF: predicated region fallthrough
CT: control target
= control target key end

     0   :  { %6 = vsyncpa [#allocation3], 0  ;;  %s116_s0 = inlined_call_operand.hbm [shape: f32[8,256], index: 0, kind: input, shape index: {}, may-alias: {0,1}]   ;;  %s117_s1 = inlined_call_operand.hbm [shape: f32[8,256], index: 1, kind: output, shape index: {}, may-alias: {0,1}]  }
   0x1   :  { %7 = vsyncpa [#allocation4], 0  ;;  %s13_s8 = sshll.u32 %s116_s0, 4  ;;  %s98_s9 = smov [#allocation2]   ;;  %s14_s8 = int_to_ptr.hbm [resolvable:$true] %s13_s8 }
   0x2   :  { %s15_s10 = sshll.u32 %s98_s9, 4  ;;  %s16_s10 = int_to_ptr.vmem [resolvable:$true] %s15_s10 }
   0x3   :  { %18 = dma.hbm_to_vmem [thread:$0]  %s14_s8, 256, %s16_s10, [#allocation3]  }
   0x4   :  { %94 = dma.done.wait [#allocation3], 256  }
   0x5   :  { %95 = vsyncadd [#allocation3], 4294967040  ;;  %s99_s11 = smov [#allocation5]   ;;  %s34_s15 = sshll.u32 %s117_s1, 4  ;;  %v23_v0 = vld [vmem:[#allocation2] sm:$0xff]  ;;  %v24_v1 = vld [vmem:[#allocation2 + $0x8] sm:$0xff]  ;;  %s35_s15 = int_to_ptr.hbm [resolvable:$true] %s34_s15 }
   0x6   :  { %s32_s12 = sshll.u32 %s99_s11, 4  ;;  %25 = vst [vmem:[#allocation5] sm:$0xff] %v23_v0  ;;  %s33_s12 = int_to_ptr.vmem [resolvable:$true] %s32_s12 }
   0x7   :  { %26 = vst [vmem:[#allocation5 + $0x8] sm:$0xff] %v24_v1 }
   0x8   :  { %37 = dma.vmem_to_hbm [thread:$0]  %s33_s12, 256, %s35_s15, [#allocation4]  }
   0x9   :  { %96 = dma.done.wait [#allocation4], 256  }
   0xa   :  { %97 = vsyncadd [#allocation4], 4294967040 }
   0xb   :  { %42 = vsyncpa [#allocation3], 1 }
   0xc   :  { %43 = vsyncpa [#allocation4], 1 }

</bundles_post_ra>
